<compile_context>
chip_gen: v5e
topology: v5e:2x2
jax: 0.10.0
libtpu: 0.0.40
codegen_flags: <defaults>
</compile_context>

<pallas_src>
import jax
import jax.numpy as jnp
from jax.experimental import pallas as pl
from jax.experimental.pallas import tpu as pltpu


def _kl_rowwise_kernel(pred_ref, label_ref, out_ref):
    """Per-row KL(softmax(label) || softmax(pred)) for one (TILE_N, C) tile.

    All math is f32 regardless of input dtype: bf16 inputs only save HBM
    bandwidth; compute stays f32 (required on v5e, harmless elsewhere).
    """
    x = pred_ref[...].astype(jnp.float32)   # prediction logits
    y = label_ref[...].astype(jnp.float32)  # label logits

    # log_softmax(prediction) pieces (numerically stable). Only the scalar-per-
    # row x_lse is needed; log_p itself is never materialized.
    x_max = jnp.max(x, axis=1, keepdims=True)
    x_sh = x - x_max
    x_lse = jnp.log(jnp.sum(jnp.exp(x_sh), axis=1, keepdims=True))

    # softmax(label) pieces, unnormalized; 1/sum is factored out per row.
    y_max = jnp.max(y, axis=1, keepdims=True)
    y_sh = y - y_max
    y_exp = jnp.exp(y_sh)
    y_sum = jnp.sum(y_exp, axis=1, keepdims=True)
    log_ysum = jnp.log(y_sum)

    # sum_j q_j*(log q_j - log p_j)
    #   = (1/y_sum) * sum_j y_exp_j*(y_sh_j - x_sh_j) + (x_lse - log_ysum)
    cross = jnp.sum(y_exp * (y_sh - x_sh), axis=1, keepdims=True)
    out_ref[...] = cross * pl.reciprocal(y_sum, approx=False) + (x_lse - log_ysum)


def _vmem_limit_bytes() -> int:
    """Generation-aware scoped VMEM limit: 64 MiB on 128-MiB chips, else 32 MiB."""
    cap = 64 * 1024 * 1024
    try:
        cap = int(getattr(pltpu.get_tpu_info(), "vmem_capacity_bytes", cap))
    except Exception:
        pass
    if cap >= 96 * 1024 * 1024:        # v5e / v6e: 128 MiB physical VMEM
        return 64 * 1024 * 1024
    return 32 * 1024 * 1024            # v7x (64 MiB physical) or unknown


def _pick_tile_n(n_rows: int, n_cols: int, itemsize: int, vmem_limit: int) -> int:
    """Largest batch tile such that stream buffers + f32 temporaries fit VMEM.

    Per row of tile:
      * streamed inputs: 2 arrays x 2 pipeline buffers x C x itemsize
      * in-kernel f32 temporaries after the algebraic rewrite (~x32, y32,
        y_exp, one product temp): ~4 x C x 4 bytes
    Budget is ~75% of the scoped limit, leaving headroom for vregs/epilogue.
    """
    mult = 8 if itemsize >= 4 else (16 if itemsize == 2 else 32)
    bytes_per_row = 2 * 2 * n_cols * itemsize + 4 * n_cols * 4
    budget = (vmem_limit * 3) // 4
    tile_n = max(mult, (budget // max(bytes_per_row, 1)) // mult * mult)

    padded_rows = ((n_rows + mult - 1) // mult) * mult
    tile_n = min(tile_n, padded_rows)

    # Megacore guard (v7x): keep >= ~4 tiles when the batch allows, so the
    # "parallel" grid axis actually shards across both TensorCores.
    if n_rows > 4 * mult:
        quarter = (((n_rows + 3) // 4 + mult - 1) // mult) * mult
        tile_n = min(tile_n, max(quarter, mult))

    return max(mult, tile_n)


def kl_loss3(prediction: jax.Array, label: jax.Array, *, tile_n=None) -> jax.Array:
    """Pallas implementation of KLLoss3.forward for 2-D (N, C) inputs."""
    assert prediction.shape == label.shape and prediction.ndim == 2
    n, c = prediction.shape
    itemsize = max(jnp.dtype(prediction.dtype).itemsize,
                   jnp.dtype(label.dtype).itemsize)
    vmem_limit = _vmem_limit_bytes()
    if tile_n is None:
        tile_n = _pick_tile_n(n, c, itemsize, vmem_limit)
    num_tiles = pl.cdiv(n, tile_n)

    # TODO(synk): for vocab-sized C, add a second ("arbitrary") grid axis over
    # classes with online-LSE accumulation; with N-only tiling C is bounded by
    # the per-tile VMEM budget.

    cost = pl.CostEstimate(
        flops=8 * n * c,                               # VPU add/sub/mul estimate
        transcendentals=2 * n * c,                     # exp(x_sh), exp(y_sh)
        bytes_accessed=2 * n * c * itemsize + n * 4,   # two logits streams + tiny out
    )

    per_row_kl = pl.pallas_call(
        _kl_rowwise_kernel,
        out_shape=jax.ShapeDtypeStruct((n, 1), jnp.float32),
        grid_spec=pltpu.PrefetchScalarGridSpec(
            num_scalar_prefetch=0,
            grid=(num_tiles,),
            in_specs=[
                pl.BlockSpec((tile_n, c), lambda i: (i, 0)),
                pl.BlockSpec((tile_n, c), lambda i: (i, 0)),
            ],
            out_specs=pl.BlockSpec((tile_n, 1), lambda i: (i, 0)),
        ),
        compiler_params=pltpu.CompilerParams(
            dimension_semantics=("parallel",),
            vmem_limit_bytes=vmem_limit,
        ),
        cost_estimate=cost,
    )(prediction, label)

    # reduction='batchmean': sum over all elements / batch size.
    return jnp.sum(per_row_kl) / jnp.float32(n)


def _reference_kl_loss3(prediction, label):
    """Pure-JAX reference (mirrors PyTorch semantics) for validation."""
    p32 = prediction.astype(jnp.float32)
    l32 = label.astype(jnp.float32)
    log_p = jax.nn.log_softmax(p32, axis=1)
    q = jax.nn.softmax(l32, axis=1)
    log_q = jax.nn.log_softmax(l32, axis=1)
    return jnp.sum(q * (log_q - log_p)) / prediction.shape[0]


if __name__ == "__main__":
    key = jax.random.PRNGKey(0)

    # (N, C, input dtype, forced tile_n) — softmax over classes (dim=1).
    cases = [
        (8, 32, jnp.float32, None),    # single tile, auto tile size
        (20, 128, jnp.float32, 8),     # multiple tiles, partial last tile
        (32, 256, jnp.bfloat16, 16),   # bf16 HBM stream, f32 in-kernel math
    ]
    for (n, c, dtype, tn) in cases:
        key, k1, k2 = jax.random.split(key, 3)
        prediction = jax.random.normal(k1, (n, c), dtype=jnp.float32).astype(dtype)
        label = jax.random.normal(k2, (n, c), dtype=jnp.float32).astype(dtype)

        loss = kl_loss3(prediction, label, tile_n=tn)
        loss = jax.block_until_ready(loss)

        ref = _reference_kl_loss3(prediction, label)
        assert jnp.allclose(loss, ref, rtol=2e-5, atol=2e-6), (n, c, dtype, loss, ref)

    print("KERNEL_OK")
</pallas_src>

<mosaic_0001>
module attributes {stable_mosaic.version = 11 : i64} {
  func.func @_kl_rowwise_kernel(%arg0: i32, %arg1: memref<8x32xf32, #tpu.memory_space<vmem>>, %arg2: memref<8x32xf32, #tpu.memory_space<vmem>>, %arg3: memref<8x1xf32, #tpu.memory_space<vmem>>) attributes {dimension_semantics = [#tpu.dimension_semantics<parallel>], iteration_bounds = array<i64: 1>, scalar_prefetch = 0 : i64, scratch_operands = 0 : i64, tpu.core_type = #tpu.core_type<tc>, window_params = [{transform_indices = @transform_0, window_bounds = array<i64: 8, 32>}, {transform_indices = @transform_1, window_bounds = array<i64: 8, 32>}, {transform_indices = @transform_2, window_bounds = array<i64: 8, 1>}]} {
    %c0 = arith.constant 0 : index
    %c0_0 = arith.constant 0 : index
    %0 = vector.load %arg1[%c0, %c0_0] : memref<8x32xf32, #tpu.memory_space<vmem>>, vector<8x32xf32>
    %c0_1 = arith.constant 0 : index
    %c0_2 = arith.constant 0 : index
    %1 = vector.load %arg2[%c0_1, %c0_2] : memref<8x32xf32, #tpu.memory_space<vmem>>, vector<8x32xf32>
    %cst = arith.constant dense<0xFF800000> : vector<8xf32>
    %2 = vector.multi_reduction <maximumf>, %0, %cst [1] : vector<8x32xf32> to vector<8xf32>
    %3 = vector.shape_cast %2 : vector<8xf32> to vector<8x1xf32>
    %4 = vector.broadcast %3 : vector<8x1xf32> to vector<8x32xf32>
    %5 = arith.subf %0, %4 : vector<8x32xf32>
    %6 = math.exp %5 : vector<8x32xf32>
    %cst_3 = arith.constant dense<0.000000e+00> : vector<8xf32>
    %7 = vector.multi_reduction <add>, %6, %cst_3 [1] : vector<8x32xf32> to vector<8xf32>
    %8 = vector.shape_cast %7 : vector<8xf32> to vector<8x1xf32>
    %9 = math.log %8 : vector<8x1xf32>
    %cst_4 = arith.constant dense<0xFF800000> : vector<8xf32>
    %10 = vector.multi_reduction <maximumf>, %1, %cst_4 [1] : vector<8x32xf32> to vector<8xf32>
    %11 = vector.shape_cast %10 : vector<8xf32> to vector<8x1xf32>
    %12 = vector.broadcast %11 : vector<8x1xf32> to vector<8x32xf32>
    %13 = arith.subf %1, %12 : vector<8x32xf32>
    %14 = math.exp %13 : vector<8x32xf32>
    %cst_5 = arith.constant dense<0.000000e+00> : vector<8xf32>
    %15 = vector.multi_reduction <add>, %14, %cst_5 [1] : vector<8x32xf32> to vector<8xf32>
    %16 = vector.shape_cast %15 : vector<8xf32> to vector<8x1xf32>
    %17 = math.log %16 : vector<8x1xf32>
    %18 = arith.subf %13, %5 : vector<8x32xf32>
    %19 = arith.mulf %14, %18 : vector<8x32xf32>
    %cst_6 = arith.constant dense<0.000000e+00> : vector<8xf32>
    %20 = vector.multi_reduction <add>, %19, %cst_6 [1] : vector<8x32xf32> to vector<8xf32>
    %21 = vector.shape_cast %20 : vector<8xf32> to vector<8x1xf32>
    %22 = tpu.reciprocal %16 : vector<8x1xf32> -> vector<8x1xf32>
    %23 = arith.mulf %21, %22 : vector<8x1xf32>
    %24 = arith.subf %9, %17 : vector<8x1xf32>
    %25 = arith.addf %23, %24 : vector<8x1xf32>
    %c0_7 = arith.constant 0 : index
    %c0_8 = arith.constant 0 : index
    %26 = vector.load %arg3[%c0_7, %c0_8] : memref<8x1xf32, #tpu.memory_space<vmem>>, vector<8x1xf32>
    tpu.vector_store %arg3[%c0_7, %c0_8], %25 {strides = array<i32>} : memref<8x1xf32, #tpu.memory_space<vmem>>, vector<8x1xf32>,
    return
  }
  func.func @transform_0(%arg0: i32) -> (i32, i32) {
    %c0_i32 = arith.constant 0 : i32
    %c0_i32_0 = arith.constant 0 : i32
    return %arg0, %c0_i32 : i32, i32
  }
  func.func @transform_1(%arg0: i32) -> (i32, i32) {
    %c0_i32 = arith.constant 0 : i32
    %c0_i32_0 = arith.constant 0 : i32
    return %arg0, %c0_i32 : i32, i32
  }
  func.func @transform_2(%arg0: i32) -> (i32, i32) {
    %c0_i32 = arith.constant 0 : i32
    %c0_i32_0 = arith.constant 0 : i32
    return %arg0, %c0_i32 : i32, i32
  }
}

</mosaic_0001>

<bundles_post_ra>
// kernel: tpu_custom_call.1
= control target key start
LH: loop header
LB: loop body
LE: loop exit
PB: predicated region body
PF: predicated region fallthrough
CT: control target
= control target key end

     0   :  { %7 = vsyncpa [#allocation3], 0  ;;  %s189_s0 = inlined_call_operand.hbm [shape: f32[8,32], index: 0, kind: input, shape index: {}]   ;;  %s190_s1 = inlined_call_operand.hbm [shape: f32[8,32], index: 1, kind: input, shape index: {}]   ;;  %s191_s2 = inlined_call_operand.vmem [shape: f32[8,1], index: 2, kind: output, shape index: {}]  }
   0x1   :  { %s14_s11 = sshll.u32 %s189_s0, 4  ;;  %s15_s11 = int_to_ptr.hbm [resolvable:$true] %s14_s11 }
   0x2   :  { %8 = vsyncpa [#allocation5], 0  ;;  %s158_s12 = smov [#allocation2]   ;;  %s25_s16 = sshll.u32 %s190_s1, 4  ;;  %s26_s16 = int_to_ptr.hbm [resolvable:$true] %s25_s16 }
   0x3   :  { %s16_s13 = sshll.u32 %s158_s12, 4  ;;  %s159_s17 = smov [#allocation4]   ;;  %s17_s13 = int_to_ptr.vmem [resolvable:$true] %s16_s13 }
   0x4   :  { %19 = dma.hbm_to_vmem [thread:$0]  %s15_s11, 128, %s17_s13, [#allocation3]  }
   0x5   :  { %s27_s18 = sshll.u32 %s159_s17, 4  ;;  %s28_s18 = int_to_ptr.vmem [resolvable:$true] %s27_s18 }
   0x6   :  { %30 = dma.hbm_to_vmem [thread:$0]  %s26_s16, 128, %s28_s18, [#allocation5]  }
   0x7   :  { %154 = dma.done.wait [#allocation3], 128  }
   0x8   :  { %155 = vsyncadd [#allocation3], 4294967168 }
   0x9   :  { %156 = dma.done.wait [#allocation5], 128  }
   0xa   :  { %157 = vsyncadd [#allocation5], 4294967168  ;;  %vm41_vm0 = vcmask 261120   ;;  %v40_v0 = vld [vmem:[#allocation4] sm:$0xff]  ;;  %v39_v2 = vld [vmem:[#allocation2] sm:$0xff]  ;;  %vm86_vm5 = vcmask 7168  }
   0xb   :  { %v53_v1 = vsel %vm41_vm0, %v40_v0, -inf  ;;  %v42_v3 = vsel %vm41_vm0, %v39_v2, -inf }
   0xc   :  { %54 = vmax.xlane.f32.xlu0 %v53_v1 }
  0x14   :  { %43 = vmax.xlane.f32.xlu0 %v42_v3 }
  0x7f   :  { %v55_v4 = vpop.xlane.xlu0 %54 }
  0x80   :  { %v56_v5 = vsub.f32 %v40_v0, %v55_v4 }
  0x82   :  { %v57_v6 = vmul.f32 1.442695, %v56_v5 }
  0x84   :  { %96 = vpow2.f32 %v57_v6 }
  0x87   :  { %v44_v7 = vpop.xlane.xlu0 %43 }
  0x88   :  { %v45_v8 = vsub.f32 %v39_v2, %v44_v7 }
  0x8a   :  { %v97_v9 = vpop.eup %96  ;;  %v46_v10 = vmul.f32 1.442695, %v45_v8  ;;  %v64_v11 = vsub.f32 %v56_v5, %v45_v8 }
  0x8b   :  { %v59_v12 = vsel %vm41_vm0, %v97_v9, 0.0 }
  0x8c   :  { %98 = vpow2.f32 %v46_v10  ;;  %60 = vadd.xlane.f32.xlu1 %v59_v12  ;;  %v65_v13 = vmul.f32 %v97_v9, %v64_v11 }
  0x8e   :  { %v66_v14 = vsel %vm41_vm0, %v65_v13, 0.0 }
  0x8f   :  { %67 = vadd.xlane.f32.xlu2 %v66_v14 }
  0x92   :  { %v99_v15 = vpop.eup %98 }
  0x93   :  { %v48_v16 = vsel %vm41_vm0, %v99_v15, 0.0 }
  0x94   :  { %49 = vadd.xlane.f32.xlu1 %v48_v16 }
  0xff   :  { %v61_v17 = vpop.xlane.xlu1 %60 }
 0x100   :  { %100 = vrcp.f32 %v61_v17  ;;  %v80_v22 = vand.u32 2147483648, %v61_v17  ;;  %v78_v24 = vand.u32 2147483647, %v61_v17  ;;  %vm74_vm2 = vweird.f32 %v61_v17 }
 0x101   :  { %102 = vlog2.f32 %v61_v17 }
 0x102   :  { %v81_v28 = vor.u32 1.1754944e-38, %v80_v22  ;;  %vm79_vm4 = vcmp.eq.f32.partialorder %v78_v24, 8.507059e+37  ;;  %v68_v33 = vpop.xlane.xlu2 %67 }
 0x106   :  { %v101_v18 = vpop.eup %100 }
 0x107   :  { %v70_v19 = vmul.f32 %v101_v18, %v61_v17  ;;  %v50_v20 = vpop.xlane.xlu1 %49  ;;  %vm75_vm1 = vweird.f32 %v101_v18  ;;  %v103_v25 = vpop.eup %102 }
 0x108   :  { %104 = vlog2.f32 %v50_v20  ;;  %vm76_vm3 = vmor %vm74_vm2, %vm75_vm1  ;;  %v63_v30 = vmul.f32 0.6931472, %v103_v25 }
 0x109   :  { %v71_v21 = vsub.f32 1.0, %v70_v19 }
 0x10b   :  { %v72_v23 = vmul.f32 %v101_v18, %v71_v21 }
 0x10d   :  { %v73_v26 = vadd.f32 %v101_v18, %v72_v23 }
 0x10e   :  { %v105_v27 = vpop.eup %104 }
 0x10f   :  { %v77_v29 = vsel %vm76_vm3, %v101_v18, %v73_v26  ;;  %v52_v31 = vmul.f32 0.6931472, %v105_v27 }
 0x110   :  { %v82_v32 = vsel %vm79_vm4, %v81_v28, %v77_v29 }
 0x111   :  { %v83_v34 = vmul.f32 %v82_v32, %v68_v33  ;;  %v84_v35 = vsub.f32 %v52_v31, %v63_v30 }
 0x113   :  { %v85_v36 = vadd.f32 %v84_v35, %v83_v34 }
 0x115   :  { %87 = vst.msk [vmem:[%s191_s2] sm:$0xff] %vm86_vm5, %v85_v36 }
 0x116   :  { %92 = vsyncpa [#allocation3], 1 }
 0x117   :  { %93 = vsyncpa [#allocation5], 1 }

</bundles_post_ra>
